<compile_context>
chip_gen: v6e
topology: v6e:2x2x1
jax: 0.10.0
libtpu: 0.0.40
codegen_flags: <defaults>
</compile_context>

<pallas_src>
import jax
import jax.numpy as jnp
import numpy as np
from jax.experimental import pallas as pl
from jax.experimental.pallas import tpu as pltpu


def _round_up(n, m):
    return ((n + m - 1) // m) * m


def mlp_kernel(alpha_ref,                # SMEM: (2,) PReLU slopes [a1, a2]
               x_ref,                    # VMEM: (tb, input_dim)
               w1_ref, b1_ref,           # (input_dim, latent), (1, latent)
               w2_ref, b2_ref,           # (latent, latent),   (1, latent)
               w3_ref, b3_ref,           # (latent, out),      (1, out)
               o_ref):                   # VMEM: (tb, out)
    x = x_ref[...]                       # f32 or bf16; MXU accumulates in f32 either way

    # Layer 1: Linear + PReLU (bias add / PReLU kept in f32 for v5e's f32-only VPU)
    h = jnp.dot(x, w1_ref[...], preferred_element_type=jnp.float32) + b1_ref[...]
    h = jnp.where(h > 0.0, h, alpha_ref[0] * h)

    # Dropout(p=0.0) is identity (eval / p=0) -> no-op.
    # Hidden block (n_hidden=1): Linear + PReLU
    h = jnp.dot(h.astype(w2_ref.dtype), w2_ref[...],
                preferred_element_type=jnp.float32) + b2_ref[...]
    h = jnp.where(h > 0.0, h, alpha_ref[1] * h)

    # Output layer: Linear
    y = jnp.dot(h.astype(w3_ref.dtype), w3_ref[...],
                preferred_element_type=jnp.float32) + b3_ref[...]
    o_ref[...] = y.astype(o_ref.dtype)


def mlp_pallas(x, params, *, tb=None, use_bf16=False):
    """x: (B, input_dim) float32.  params: dict of weights/biases/alphas."""
    B, input_dim = x.shape
    latent = params["w1"].shape[1]
    out_dim = params["w3"].shape[1]

    w1, w2, w3 = params["w1"], params["w2"], params["w3"]
    if use_bf16:
        # Halve the dominant x DMA stream; accumulation stays f32 inside the kernel.
        x = x.astype(jnp.bfloat16)
        w1 = w1.astype(jnp.bfloat16)
        w2 = w2.astype(jnp.bfloat16)
        w3 = w3.astype(jnp.bfloat16)

    # Sublane packing multiple of the x tile dtype (f32: 8 rows/vreg, bf16: 16).
    sub = 16 if use_bf16 else 8
    if tb is None:
        # Large batch tiles amortize the per-grid-step overhead; VMEM cost is trivial at these widths
        # (x tile = tb*input_dim*4B, out tile = tb*out_dim*4B, weights ~7 KiB), so even tb=1024
        # double-buffered is far under the scoped-VMEM default on every generation.  Capped at 1024 so
        # batches >1024 still produce >=2 "parallel" grid steps (v7x has 2 TensorCores).
        tb = min(1024, _round_up(B, sub))
        if B <= 8:
            tb = B  # block == full array along batch; always legal regardless of sublane multiple

    grid = (pl.cdiv(B, tb),)          # ragged last tile masked by Pallas (no jnp.pad / extra HBM pass)
    rep = lambda i: (0, 0)            # replicate weights across batch tiles (DMA'd once, then revisited)

    alphas = jnp.concatenate([params["a1"], params["a2"]])   # (2,) scalar path

    # Advisory cost hint for XLA's scheduler around the custom call.
    flops = 2 * B * (input_dim * latent + latent * latent + latent * out_dim)
    bytes_accessed = (x.size * x.dtype.itemsize
                      + (w1.size + w2.size + w3.size) * w1.dtype.itemsize
                      + (params["b1"].size + params["b2"].size + params["b3"].size) * 4
                      + B * out_dim * 4)
    cost = pl.CostEstimate(flops=int(flops), transcendentals=0,
                           bytes_accessed=int(bytes_accessed))

    out = pl.pallas_call(
        mlp_kernel,
        out_shape=jax.ShapeDtypeStruct((B, out_dim), jnp.float32),
        grid_spec=pltpu.PrefetchScalarGridSpec(
            num_scalar_prefetch=0,
            grid=grid,
            in_specs=[
                pl.BlockSpec(memory_space=pltpu.SMEM),            # alphas (2,)
                pl.BlockSpec((tb, input_dim), lambda i: (i, 0)),  # x tile
                pl.BlockSpec((input_dim, latent), rep),           # w1
                pl.BlockSpec((1, latent), rep),                   # b1
                pl.BlockSpec((latent, latent), rep),              # w2
                pl.BlockSpec((1, latent), rep),                   # b2
                pl.BlockSpec((latent, out_dim), rep),             # w3
                pl.BlockSpec((1, out_dim), rep),                  # b3
            ],
            out_specs=pl.BlockSpec((tb, out_dim), lambda i: (i, 0)),
        ),
        compiler_params=pltpu.CompilerParams(
            dimension_semantics=("parallel",)),                   # batch tiles shard across v7x's 2 TCs
        cost_estimate=cost,
    )(alphas, x,
      w1, params["b1"],
      w2, params["b2"],
      w3, params["b3"])

    return out


def init_params(key, input_dim, latent_dim, output_dim):
    """Deterministic init mirroring nn.Linear (U(-1/sqrt(fan_in), 1/sqrt(fan_in))) and PReLU (0.25)."""
    ks = jax.random.split(key, 6)

    def linear(kw, kb, fan_in, fan_out):
        bound = 1.0 / np.sqrt(fan_in)
        w = jax.random.uniform(kw, (fan_in, fan_out), jnp.float32, -bound, bound)
        b = jax.random.uniform(kb, (1, fan_out), jnp.float32, -bound, bound)
        return w, b

    w1, b1 = linear(ks[0], ks[1], input_dim, latent_dim)
    w2, b2 = linear(ks[2], ks[3], latent_dim, latent_dim)
    w3, b3 = linear(ks[4], ks[5], latent_dim, output_dim)
    return dict(
        w1=w1, b1=b1, w2=w2, b2=b2, w3=w3, b3=b3,
        a1=jnp.full((1,), 0.25, jnp.float32),   # PReLU default slope
        a2=jnp.full((1,), 0.25, jnp.float32),
    )


def mlp_ref(x, p):
    """Pure-JAX reference of the same forward pass."""
    h = x @ p["w1"] + p["b1"]
    h = jnp.where(h > 0, h, p["a1"][0] * h)
    h = h @ p["w2"] + p["b2"]
    h = jnp.where(h > 0, h, p["a2"][0] * h)
    return h @ p["w3"] + p["b3"]


if __name__ == "__main__":
    # Small shapes consistent with MLP(input_dim=16, output_dim=8, n_hidden=1, latent_dim=32)
    B, input_dim, latent_dim, output_dim = 2, 16, 32, 8

    key = jax.random.PRNGKey(0)
    kx, kp = jax.random.split(key)
    x = jax.random.normal(kx, (B, input_dim), jnp.float32)
    params = init_params(kp, input_dim, latent_dim, output_dim)

    # Small-batch path: single full-array block.
    y = jax.block_until_ready(mlp_pallas(x, params))
    np.testing.assert_allclose(np.asarray(y), np.asarray(mlp_ref(x, params)),
                               rtol=1e-5, atol=1e-5)

    # Multi-step + ragged-tile path (no jnp.pad): 4 batch tiles, last one partial.
    x2 = jax.random.normal(kx, (100, input_dim), jnp.float32)
    y2 = jax.block_until_ready(mlp_pallas(x2, params, tb=32))
    np.testing.assert_allclose(np.asarray(y2), np.asarray(mlp_ref(x2, params)),
                               rtol=1e-5, atol=1e-5)

    # Default-tile path on a larger batch (tb=1024, 3 grid steps, last ragged).
    x3 = jax.random.normal(kx, (2500, input_dim), jnp.float32)
    y3 = jax.block_until_ready(mlp_pallas(x3, params))
    np.testing.assert_allclose(np.asarray(y3), np.asarray(mlp_ref(x3, params)),
                               rtol=1e-5, atol=1e-5)

    # Optional bf16-input path (halves the dominant x DMA stream), looser tolerance.
    y4 = jax.block_until_ready(mlp_pallas(x2, params, tb=32, use_bf16=True))
    np.testing.assert_allclose(np.asarray(y4), np.asarray(mlp_ref(x2, params)),
                               rtol=5e-2, atol=5e-2)

    print("KERNEL_OK")
</pallas_src>

<mosaic_0001>
module attributes {stable_mosaic.version = 11 : i64} {
  func.func @mlp_kernel(%arg0: i32, %arg1: memref<2xf32, #tpu.memory_space<smem>>, %arg2: memref<2x16xf32, #tpu.memory_space<vmem>>, %arg3: memref<16x32xf32, #tpu.memory_space<vmem>>, %arg4: memref<1x32xf32, #tpu.memory_space<vmem>>, %arg5: memref<32x32xf32, #tpu.memory_space<vmem>>, %arg6: memref<1x32xf32, #tpu.memory_space<vmem>>, %arg7: memref<32x8xf32, #tpu.memory_space<vmem>>, %arg8: memref<1x8xf32, #tpu.memory_space<vmem>>, %arg9: memref<2x8xf32, #tpu.memory_space<vmem>>) attributes {dimension_semantics = [#tpu.dimension_semantics<parallel>], iteration_bounds = array<i64: 1>, scalar_prefetch = 0 : i64, scratch_operands = 0 : i64, tpu.core_type = #tpu.core_type<tc>, window_params = [{transform_indices = @transform_0, window_bounds = array<i64: 2>}, {transform_indices = @transform_1, window_bounds = array<i64: 2, 16>}, {pipeline_mode = #tpu.pipeline_mode<synchronous>, transform_indices = @transform_2, window_bounds = array<i64: 16, 32>}, {pipeline_mode = #tpu.pipeline_mode<synchronous>, transform_indices = @transform_3, window_bounds = array<i64: 1, 32>}, {pipeline_mode = #tpu.pipeline_mode<synchronous>, transform_indices = @transform_4, window_bounds = array<i64: 32, 32>}, {pipeline_mode = #tpu.pipeline_mode<synchronous>, transform_indices = @transform_5, window_bounds = array<i64: 1, 32>}, {pipeline_mode = #tpu.pipeline_mode<synchronous>, transform_indices = @transform_6, window_bounds = array<i64: 32, 8>}, {pipeline_mode = #tpu.pipeline_mode<synchronous>, transform_indices = @transform_7, window_bounds = array<i64: 1, 8>}, {transform_indices = @transform_8, window_bounds = array<i64: 2, 8>}]} {
    %c0 = arith.constant 0 : index
    %c0_0 = arith.constant 0 : index
    %0 = vector.load %arg2[%c0, %c0_0] : memref<2x16xf32, #tpu.memory_space<vmem>>, vector<2x16xf32>
    %c0_1 = arith.constant 0 : index
    %c0_2 = arith.constant 0 : index
    %1 = vector.load %arg3[%c0_1, %c0_2] : memref<16x32xf32, #tpu.memory_space<vmem>>, vector<16x32xf32>
    %cst = arith.constant dense<0.000000e+00> : vector<2x32xf32>
    %2 = tpu.matmul %0, %1, %cst {dimension_numbers = #tpu.dot_dimension_numbers<[1], [0], [0], [1], [0, 0, 1, 1], [], []>} : vector<2x16xf32>, vector<16x32xf32>, vector<2x32xf32> -> vector<2x32xf32>
    %c0_3 = arith.constant 0 : index
    %c0_4 = arith.constant 0 : index
    %3 = vector.load %arg4[%c0_3, %c0_4] : memref<1x32xf32, #tpu.memory_space<vmem>>, vector<1x32xf32>
    %4 = vector.broadcast %3 : vector<1x32xf32> to vector<2x32xf32>
    %5 = arith.addf %2, %4 : vector<2x32xf32>
    %cst_5 = arith.constant 0.000000e+00 : f32
    %6 = vector.broadcast %cst_5 : f32 to vector<2x32xf32>
    %7 = arith.cmpf ogt, %5, %6 : vector<2x32xf32>
    %c0_6 = arith.constant 0 : index
    %8 = memref.load %arg1[%c0_6] : memref<2xf32, #tpu.memory_space<smem>>
    %9 = vector.broadcast %8 : f32 to vector<2x32xf32>
    %10 = arith.mulf %9, %5 : vector<2x32xf32>
    %11 = arith.select %7, %5, %10 : vector<2x32xi1>, vector<2x32xf32>
    %c0_7 = arith.constant 0 : index
    %c0_8 = arith.constant 0 : index
    %12 = vector.load %arg5[%c0_7, %c0_8] : memref<32x32xf32, #tpu.memory_space<vmem>>, vector<32x32xf32>
    %cst_9 = arith.constant dense<0.000000e+00> : vector<2x32xf32>
    %13 = tpu.matmul %11, %12, %cst_9 {dimension_numbers = #tpu.dot_dimension_numbers<[1], [0], [0], [1], [0, 0, 1, 1], [], []>} : vector<2x32xf32>, vector<32x32xf32>, vector<2x32xf32> -> vector<2x32xf32>
    %c0_10 = arith.constant 0 : index
    %c0_11 = arith.constant 0 : index
    %14 = vector.load %arg6[%c0_10, %c0_11] : memref<1x32xf32, #tpu.memory_space<vmem>>, vector<1x32xf32>
    %15 = vector.broadcast %14 : vector<1x32xf32> to vector<2x32xf32>
    %16 = arith.addf %13, %15 : vector<2x32xf32>
    %cst_12 = arith.constant 0.000000e+00 : f32
    %17 = vector.broadcast %cst_12 : f32 to vector<2x32xf32>
    %18 = arith.cmpf ogt, %16, %17 : vector<2x32xf32>
    %c1 = arith.constant 1 : index
    %19 = memref.load %arg1[%c1] : memref<2xf32, #tpu.memory_space<smem>>
    %20 = vector.broadcast %19 : f32 to vector<2x32xf32>
    %21 = arith.mulf %20, %16 : vector<2x32xf32>
    %22 = arith.select %18, %16, %21 : vector<2x32xi1>, vector<2x32xf32>
    %c0_13 = arith.constant 0 : index
    %c0_14 = arith.constant 0 : index
    %23 = vector.load %arg7[%c0_13, %c0_14] : memref<32x8xf32, #tpu.memory_space<vmem>>, vector<32x8xf32>
    %cst_15 = arith.constant dense<0.000000e+00> : vector<2x8xf32>
    %24 = tpu.matmul %22, %23, %cst_15 {dimension_numbers = #tpu.dot_dimension_numbers<[1], [0], [0], [1], [0, 0, 1, 1], [], []>} : vector<2x32xf32>, vector<32x8xf32>, vector<2x8xf32> -> vector<2x8xf32>
    %c0_16 = arith.constant 0 : index
    %c0_17 = arith.constant 0 : index
    %25 = vector.load %arg8[%c0_16, %c0_17] : memref<1x8xf32, #tpu.memory_space<vmem>>, vector<1x8xf32>
    %26 = vector.broadcast %25 : vector<1x8xf32> to vector<2x8xf32>
    %27 = arith.addf %24, %26 : vector<2x8xf32>
    %c0_18 = arith.constant 0 : index
    %c0_19 = arith.constant 0 : index
    %28 = vector.load %arg9[%c0_18, %c0_19] : memref<2x8xf32, #tpu.memory_space<vmem>>, vector<2x8xf32>
    tpu.vector_store %arg9[%c0_18, %c0_19], %27 {strides = array<i32>} : memref<2x8xf32, #tpu.memory_space<vmem>>, vector<2x8xf32>,
    return
  }
  func.func @transform_0(%arg0: i32) -> i32 {
    %c0_i32 = arith.constant 0 : i32
    %c0_i32_0 = arith.constant 0 : i32
    return %c0_i32 : i32
  }
  func.func @transform_1(%arg0: i32) -> (i32, i32) {
    %c0_i32 = arith.constant 0 : i32
    %c0_i32_0 = arith.constant 0 : i32
    return %arg0, %c0_i32 : i32, i32
  }
  func.func @transform_2(%arg0: i32) -> (i32, i32) {
    %c0_i32 = arith.constant 0 : i32
    %c0_i32_0 = arith.constant 0 : i32
    %c0_i32_1 = arith.constant 0 : i32
    return %c0_i32, %c0_i32_0 : i32, i32
  }
  func.func @transform_3(%arg0: i32) -> (i32, i32) {
    %c0_i32 = arith.constant 0 : i32
    %c0_i32_0 = arith.constant 0 : i32
    %c0_i32_1 = arith.constant 0 : i32
    return %c0_i32, %c0_i32_0 : i32, i32
  }
  func.func @transform_4(%arg0: i32) -> (i32, i32) {
    %c0_i32 = arith.constant 0 : i32
    %c0_i32_0 = arith.constant 0 : i32
    %c0_i32_1 = arith.constant 0 : i32
    return %c0_i32, %c0_i32_0 : i32, i32
  }
  func.func @transform_5(%arg0: i32) -> (i32, i32) {
    %c0_i32 = arith.constant 0 : i32
    %c0_i32_0 = arith.constant 0 : i32
    %c0_i32_1 = arith.constant 0 : i32
    return %c0_i32, %c0_i32_0 : i32, i32
  }
  func.func @transform_6(%arg0: i32) -> (i32, i32) {
    %c0_i32 = arith.constant 0 : i32
    %c0_i32_0 = arith.constant 0 : i32
    %c0_i32_1 = arith.constant 0 : i32
    return %c0_i32, %c0_i32_0 : i32, i32
  }
  func.func @transform_7(%arg0: i32) -> (i32, i32) {
    %c0_i32 = arith.constant 0 : i32
    %c0_i32_0 = arith.constant 0 : i32
    %c0_i32_1 = arith.constant 0 : i32
    return %c0_i32, %c0_i32_0 : i32, i32
  }
  func.func @transform_8(%arg0: i32) -> (i32, i32) {
    %c0_i32 = arith.constant 0 : i32
    %c0_i32_0 = arith.constant 0 : i32
    return %arg0, %c0_i32 : i32, i32
  }
}

</mosaic_0001>

<bundles_post_ra>
// kernel: tpu_custom_call.1
= control target key start
LH: loop header
LB: loop body
LE: loop exit
PB: predicated region body
PF: predicated region fallthrough
CT: control target
= control target key end

     0   :  { %13 = vsyncpa [#allocation5], 0  ;;  %s551_s0 = inlined_call_operand.vmem [shape: f32[2], index: 0, kind: input, shape index: {}]   ;;  %s552_s1 = inlined_call_operand.vmem [shape: f32[2,16], index: 1, kind: input, shape index: {}]   ;;  %s553_s2 = inlined_call_operand.hbm [shape: f32[16,32], index: 2, kind: input, shape index: {}]   ;;  %s554_s3 = inlined_call_operand.vmem [shape: f32[1,32], index: 3, kind: input, shape index: {}]   ;;  %s555_s4 = inlined_call_operand.vmem [shape: f32[32,32], index: 4, kind: input, shape index: {}]   ;;  %s556_s5 = inlined_call_operand.vmem [shape: f32[1,32], index: 5, kind: input, shape index: {}]   ;;  %s557_s6 = inlined_call_operand.vmem [shape: f32[32,8], index: 6, kind: input, shape index: {}]   ;;  %s558_s7 = inlined_call_operand.vmem [shape: f32[1,8], index: 7, kind: input, shape index: {}]   ;;  %s559_s8 = inlined_call_operand.hbm [shape: f32[2,8], index: 8, kind: output, shape index: {}]  }
   0x1   :  { %14 = vsyncpa [#allocation3], 0 }
   0x2   :  { %15 = vsyncpa [#allocation4], 0  ;;  %s22_s29 = sshll.u32 %s551_s0, 4  ;;  %s23_s29 = int_to_ptr.vmem [resolvable:$true] %s22_s29 }
   0x3   :  { %s394_s30 = scalar_lea.vmem %s23_s29, 16  ;;  %p399_p1 = scmp.lt.s32.totalorder %s23_s29, %s23_s29 }
   0x4   :  { %p395_p0 = scmp.ne.s32.totalorder %s23_s29, %s394_s30  ;;  %p400_p2 = scmp.lt.s32.totalorder %s394_s30, %s394_s30 }
   0x6   :  { %p401_p3 = por %p400_p2, %p399_p1 }
   0x8   :  { %p402_p4 = pnand %p401_p3, %p395_p0 }
   0xa   :  { %405 = shalt.err (!%p402_p4)
}
   0xb   :  { %s452_s9 = smov [#allocation2]   ;;  %s453_s10 = smov [#allocation6]  }
   0xc   :  { %25 = dma.vmem_to_smem %s23_s29, 16, %s452_s9, [#allocation5]  }
   0xd   :  { %s33_s11 = sshll.u32 %s453_s10, 4  ;;  %s34_s11 = int_to_ptr.vmem [resolvable:$true] %s33_s11 }
   0xe   :  { %s414_s12 = scalar_lea.vmem %s34_s11, 256  ;;  %p419_p6 = scmp.lt.s32.totalorder %s34_s11, %s34_s11 }
   0xf   :  { %p415_p5 = scmp.ne.s32.totalorder %s34_s11, %s414_s12  ;;  %p420_p7 = scmp.lt.s32.totalorder %s414_s12, %s414_s12 }
  0x11   :  { %p421_p8 = por %p420_p7, %p419_p6 }
  0x13   :  { %p422_p9 = pnand %p421_p8, %p415_p5 }
  0x15   :  { %425 = shalt.err (!%p422_p9)
}
  0x16   :  { %s454_s0 = smov 128   ;;  %s455_s13 = smov 8  }
  0x17   :  { %39 = dma.hbm_to_vmem [thread:$0]  %s553_s2, 256, %s34_s11, [#allocation3], %s454_s0, %s454_s0, %s455_s13  }
  0x18   :  { %446 = dma.done.wait [#allocation5], 16  }
  0x19   :  { %447 = vsyncadd [#allocation5], 4294967280 }
  0x1a   :  { %448 = dma.done.wait [#allocation3], 256  }
  0x1b   :  { %449 = vsyncadd [#allocation3], 4294967040 }
  0x1c   :  { %56 = sfence }
  0x1d   :  { %v59_v0 = vld [vmem:[#allocation6 + $0x8] sm:$0xff]  ;;  %v456_v1 = vmov 0.0   ;;  %v58_v2 = vld [vmem:[#allocation6] sm:$0xff]  ;;  %vm457_vm0 = vmmov 0   ;;  %v149_v3 = vld [vmem:[%s555_s4 + $0x18] sm:$0xff]  ;;  %vm67_vm1 = vcmask 130048  }
  0x1e   :  { %358 = vmatprep.subr.mxu0 %v456_v1  ;;  %362 = vmatprep.mubr.msk.f32.mxu0 %vm457_vm0, %v456_v1  ;;  %v57_v4 = vld [vmem:[%s552_s1] sm:$0x3]  ;;  %v148_v5 = vld [vmem:[%s555_s4 + $0x10] sm:$0xff]  ;;  %v147_v6 = vld [vmem:[%s555_s4 + $0x8] sm:$0xff]  ;;  %s142_s26 = sld [smem:[#allocation2]]  ;;  %vm157_vm3 = vcmask 261120  }
  0x1f   :  { %359 = vmatpush3.msra.mxu0 %v59_v0  ;;  %365 = vmatprep.subr.mxu1 %v456_v1  ;;  %v146_v7 = vld [vmem:[%s555_s4] sm:$0xff]  ;;  %v239_v8 = vld [vmem:[%s557_s6 + $0x18] sm:$0xff]  ;;  %v238_v16 = vld [vmem:[%s557_s6 + $0x10] sm:$0xff]  ;;  %s342_s11 = sld [smem:[#allocation2 + $0x1]]  ;;  %vm320_vm5 = vcmask 58368  }
  0x20   :  { %360 = vmatprep.subr.mxu0 %v456_v1  ;;  %366 = vmatpush3.msra.mxu1 %v149_v3  ;;  %v338_v9 = vld [vmem:[%s554_s3] ss:$0 sm:$0xff]  ;;  %v237_v17 = vld [vmem:[%s557_s6 + $0x8] sm:$0xff] }
  0x21   :  { %361 = vmatpush3.msra.mxu0 %v58_v2  ;;  %367 = vmatprep.subr.mxu1 %v456_v1  ;;  %v236_v18 = vld [vmem:[%s557_s6] sm:$0xff]  ;;  %s458_s6 = smov [#allocation7]  }
  0x22   :  { %363 = vmatmul.mubr.msk.f32.vlgmr.msra.gmra.mxu0 %vm67_vm1, %v57_v4  ;;  %373 = vmatprep.mubr.msk.f32.mxu1 %vm457_vm0, %v456_v1  ;;  %v340_v19 = vld [vmem:[%s556_s5] ss:$0 sm:$0xff]  ;;  %s328_s15 = sshll.u32 %s458_s6, 4  ;;  %s329_s15 = int_to_ptr.vmem [resolvable:$true] %s328_s15 }
  0x23   :  { %376 = vmatprep.subr.mxu0 %v456_v1  ;;  %384 = vmatprep.mubr.msk.f32.mxu0 %vm457_vm0, %v456_v1  ;;  %v343_v26 = vld [vmem:[%s558_s7] ss:$0 sm:$0xff]  ;;  %s426_s5 = scalar_lea.vmem %s329_s15, 32  ;;  %p431_p11 = scmp.lt.s32.totalorder %s329_s15, %s329_s15 }
  0x24   :  { %368 = vmatpush3.msra.mxu1 %v148_v5  ;;  %377 = vmatpush3.msra.mxu0 %v239_v8  ;;  %v143_v11 = vstv %s142_s26  ;;  %p427_p10 = scmp.ne.s32.totalorder %s329_s15, %s426_s5  ;;  %p432_p12 = scmp.lt.s32.totalorder %s426_s5, %s426_s5 }
  0x25   :  { %369 = vmatprep.subr.mxu1 %v456_v1  ;;  %378 = vmatprep.subr.mxu0 %v456_v1  ;;  %v233_v21 = vstv %s342_s11 }
  0x26   :  { %370 = vmatpush3.msra.mxu1 %v147_v6  ;;  %379 = vmatpush3.msra.mxu0 %v238_v16  ;;  %p433_p13 = por %p432_p12, %p431_p11 }
  0x27   :  { %371 = vmatprep.subr.mxu1 %v456_v1  ;;  %380 = vmatprep.subr.mxu0 %v456_v1 }
  0x28   :  { %372 = vmatpush3.msra.mxu1 %v146_v7  ;;  %381 = vmatpush3.msra.mxu0 %v237_v17  ;;  %p434_p0 = pnand %p433_p13, %p427_p10 }
  0x29   :  { %382 = vmatprep.subr.mxu0 %v456_v1 }
  0x2a   :  { %383 = vmatpush3.msra.mxu0 %v236_v18 }
  0xe2   :  { %v137_v10 = vpop.f32.mrf.mxu0 }
  0xe3   :  { %v138_v12 = vadd.f32 %v338_v9, %v137_v10 }
  0xe4   :  { %v364_v13 = vpop.f32.mrf.mxu0 }
  0xe5   :  { %vm141_vm2 = vcmp.gt.f32.partialorder %v138_v12, 0.0  ;;  %v144_v14 = vmul.f32 %v143_v11, %v138_v12 }
  0xe7   :  { %v145_v15 = vsel %vm141_vm2, %v138_v12, %v144_v14 }
  0xe8   :  { %374 = vmatmul.mubr.msk.f32.vlgmr.msra.gmra.mxu1 %vm157_vm3, %v145_v15 }
 0x1a8   :  { %v227_v20 = vpop.f32.mrf.mxu1 }
 0x1a9   :  { %v228_v22 = vadd.f32 %v340_v19, %v227_v20 }
 0x1aa   :  { %v375_v23 = vpop.f32.mrf.mxu1 }
 0x1ab   :  { %vm231_vm4 = vcmp.gt.f32.partialorder %v228_v22, 0.0  ;;  %v234_v24 = vmul.f32 %v233_v21, %v228_v22 }
 0x1ad   :  { %v235_v25 = vsel %vm231_vm4, %v228_v22, %v234_v24 }
 0x1ae   :  { %385 = vmatmul.mubr.msk.f32.vlgmr.msra.gmra.mxu0 %vm157_vm3, %v235_v25 }
 0x26e   :  { %v316_v27 = vpop.f32.mrf.mxu0 }
 0x26f   :  { %v317_v28 = vadd.f32 %v343_v26, %v316_v27 }
 0x270   :  { %v386_v29 = vpop.f32.mrf.mxu0 }
 0x271   :  { %321 = vst.msk [vmem:[#allocation7] sm:$0x3] %vm320_vm5, %v317_v28 }
 0x272   :  { %437 = shalt.err (!%p434_p0)
}
 0x273   :  { %331 = dma.vmem_to_hbm [thread:$0]  %s329_s15, 32, %s559_s8, [#allocation4]  }
 0x274   :  { %450 = dma.done.wait [#allocation4], 32  }
 0x275   :  { %451 = vsyncadd [#allocation4], 4294967264 }
 0x276   :  { %335 = vsyncpa [#allocation3], 1 }
 0x277   :  { %336 = vsyncpa [#allocation4], 1 }
 0x278   :  { %337 = vsyncpa [#allocation5], 1 }

</bundles_post_ra>
